<compile_context>
chip_gen: v7x
topology: tpu7x:2x2x1
jax: 0.10.0
libtpu: 0.0.40
codegen_flags: <defaults>
</compile_context>

<pallas_src>
import jax
import jax.numpy as jnp
from jax.experimental import pallas as pl
from jax.experimental.pallas import tpu as pltpu


# ----------------------------------------------------------------------------
# Kernel
# ----------------------------------------------------------------------------
def _qnet_kernel(s_ref, a_ref, w1s_ref, w1a_ref, w2_ref, w3_ref, b_ref, q_ref):
    """Fused twin-Q 3-layer MLP. Runs entirely in VMEM for one batch tile."""
    # Packed biases (f32): row 0 = b1 (2Hp), row 1 = b2 (2Hp), row 2[:2] = b3.
    b1 = b_ref[0:1, :]                       # (1, 2Hp)
    b2 = b_ref[1:2, :]                       # (1, 2Hp)
    b3 = b_ref[2:3, :][:, 0:2]               # (1, 2)

    # No-op if the caller already supplies bf16 inputs.
    s = s_ref[...].astype(jnp.bfloat16)
    a = a_ref[...].astype(jnp.bfloat16)

    # Layer 1 (concat fused): h = [state|action] @ W1 + b1, both heads at once.
    h = (jnp.dot(s, w1s_ref[...], preferred_element_type=jnp.float32)
         + jnp.dot(a, w1a_ref[...], preferred_element_type=jnp.float32)
         + b1)
    h = jnp.maximum(h, 0.0)

    # Layer 2 (block-diagonal, both heads at once).
    h = jnp.dot(h.astype(jnp.bfloat16), w2_ref[...],
                preferred_element_type=jnp.float32) + b2
    h = jnp.maximum(h, 0.0)

    # Layer 3 -> (TB, 2): column 0 = q1, column 1 = q2.
    q = jnp.dot(h.astype(jnp.bfloat16), w3_ref[...],
                preferred_element_type=jnp.float32) + b3
    q_ref[...] = q.astype(q_ref.dtype)


# ----------------------------------------------------------------------------
# Wrapper
# ----------------------------------------------------------------------------
def _round_up(x, m):
    return ((x + m - 1) // m) * m


def _choose_batch_tile(B, max_tb):
    """Pick the batch tile size TB.

    - Large B: big multiple-of-8 tiles (ragged tail handled by masked
      writeback of the partial output block).
    - Single-tile B that is still >= 2048 rows: split into >= 2 tiles so the
      "parallel" grid axis can shard across v7x's two TensorCores.
    - Small B: one tile equal to the full batch dim (always layout-legal).
    """
    B8 = _round_up(B, 8)
    if B8 > max_tb:
        return max_tb
    if B8 >= 2048:
        return min(max_tb, _round_up(pl.cdiv(B8, 2), 8))
    return B


def qnetwork_forward(state, action, packed, *, max_tb=2048):
    """Pallas-backed equivalent of QNetwork.forward(state, action).

    state:  (B, state_dim)  f32 or bf16 (bf16 preferred for large B)
    action: (B, action_dim) f32 or bf16
    packed: dict from pack_params(); heads merged, hidden width padded to a
            multiple of 128, weights bf16, biases packed into one (3, 2Hp) f32.
    Returns (q1, q2), each of shape (B, 1), float32.
    """
    B, state_dim = state.shape
    action_dim = action.shape[1]
    H2p = packed["w2"].shape[0]             # padded 2 * hidden_dim

    max_tb = max(8, _round_up(max_tb, 8))
    TB = _choose_batch_tile(B, max_tb)
    grid = (pl.cdiv(B, TB),)

    def batch_map(i):
        return (i, 0)

    def const_map(i):
        return (0, 0)

    weights = (packed["w1s"], packed["w1a"], packed["w2"], packed["w3"],
               packed["b"])
    weight_bytes = int(sum(w.size * w.dtype.itemsize for w in weights))

    # Large-hidden insurance: if the (constant-index) weights would dominate
    # VMEM when double-buffered, request a single buffer for them.  Inactive
    # at small hidden sizes.
    single_buffer_weights = weight_bytes > (16 << 20)

    def weight_spec(w):
        if single_buffer_weights:
            return pl.BlockSpec(w.shape, const_map,
                                pipeline_mode=pl.Buffered(1))
        return pl.BlockSpec(w.shape, const_map)

    in_specs = [
        pl.BlockSpec((TB, state_dim), batch_map),
        pl.BlockSpec((TB, action_dim), batch_map),
        weight_spec(packed["w1s"]),
        weight_spec(packed["w1a"]),
        weight_spec(packed["w2"]),
        weight_spec(packed["w3"]),
        weight_spec(packed["b"]),
    ]
    out_specs = pl.BlockSpec((TB, 2), batch_map)

    operands = (state, action) + weights

    # Advisory cost + VMEM budget (only passed explicitly when weights are big).
    flops = 2 * B * ((state_dim + action_dim) * H2p + H2p * H2p + H2p * 2)
    bytes_accessed = int(
        sum(int(o.size) * o.dtype.itemsize for o in operands) + B * 2 * 4)
    row_bytes = (state.dtype.itemsize * state_dim
                 + action.dtype.itemsize * action_dim + 2 * 4)
    vmem_needed = ((1 if single_buffer_weights else 2) * weight_bytes
                   + 2 * TB * row_bytes + 4 * TB * H2p * 4)
    vmem_limit = None
    if vmem_needed > (24 << 20):
        vmem_limit = min(int(vmem_needed) + (8 << 20), 128 << 20)

    q = pl.pallas_call(
        _qnet_kernel,
        out_shape=jax.ShapeDtypeStruct((B, 2), jnp.float32),
        grid=grid,
        in_specs=in_specs,
        out_specs=out_specs,
        compiler_params=pltpu.CompilerParams(
            dimension_semantics=("parallel",),
            vmem_limit_bytes=vmem_limit),
        cost_estimate=pl.CostEstimate(
            flops=flops, transcendentals=0, bytes_accessed=bytes_accessed),
    )(*operands)

    return q[:, 0:1], q[:, 1:2]


# ----------------------------------------------------------------------------
# Parameters (PyTorch Linear semantics, stored pre-transposed as (in, out))
# ----------------------------------------------------------------------------
def init_params(key, state_dim, action_dim, hidden_dim):
    in_dim = state_dim + action_dim
    keys = jax.random.split(key, 12)

    def lin(kw, kb, fan_in, fan_out):
        bound = 1.0 / jnp.sqrt(fan_in)
        w = jax.random.uniform(kw, (fan_in, fan_out), jnp.float32, -bound, bound)
        b = jax.random.uniform(kb, (1, fan_out), jnp.float32, -bound, bound)
        return w, b

    w1a, b1a = lin(keys[0], keys[1], in_dim, hidden_dim)
    w2a, b2a = lin(keys[2], keys[3], hidden_dim, hidden_dim)
    w3a, b3a = lin(keys[4], keys[5], hidden_dim, 1)
    w1b, b1b = lin(keys[6], keys[7], in_dim, hidden_dim)
    w2b, b2b = lin(keys[8], keys[9], hidden_dim, hidden_dim)
    w3b, b3b = lin(keys[10], keys[11], hidden_dim, 1)
    return dict(
        w1a=w1a, b1a=b1a, w2a=w2a, b2a=b2a, w3a=w3a, b3a=b3a,
        w1b=w1b, b1b=b1b, w2b=w2b, b2b=b2b, w3b=w3b, b3b=b3b,
    )


def pack_params(p, state_dim, action_dim, hidden_dim, mxu_dtype=jnp.bfloat16):
    """One-time (outside hot path) packing of the twin heads into merged
    weights for the fused kernel, with the hidden width 2H zero-padded to a
    multiple of 128 lanes.  The zero pad is mathematically inert: padded h
    columns are relu(0)=0 and feed zero rows of the next layer's weight."""
    H = hidden_dim
    H2 = 2 * H
    H2p = max(128, _round_up(H2, 128))        # padded hidden width

    # Layer 1: heads concatenated on the output axis, rows split state/action.
    w1 = jnp.zeros((state_dim + action_dim, H2p), jnp.float32)
    w1 = w1.at[:, :H].set(p["w1a"]).at[:, H:H2].set(p["w1b"])
    w1s = w1[:state_dim].astype(mxu_dtype)                 # (state_dim, 2Hp)
    w1a = w1[state_dim:].astype(mxu_dtype)                 # (action_dim, 2Hp)

    # Layer 2: block-diagonal.
    w2 = jnp.zeros((H2p, H2p), jnp.float32)
    w2 = w2.at[:H, :H].set(p["w2a"]).at[H:H2, H:H2].set(p["w2b"])
    w2 = w2.astype(mxu_dtype)

    # Layer 3: column 0 = q1 head, column 1 = q2 head.
    w3 = jnp.zeros((H2p, 2), jnp.float32)
    w3 = w3.at[:H, 0:1].set(p["w3a"]).at[H:H2, 1:2].set(p["w3b"])
    w3 = w3.astype(mxu_dtype)

    # Packed biases (zero in the padded columns).
    b1 = jnp.zeros((H2p,), jnp.float32)
    b1 = b1.at[:H].set(p["b1a"][0]).at[H:H2].set(p["b1b"][0])
    b2 = jnp.zeros((H2p,), jnp.float32)
    b2 = b2.at[:H].set(p["b2a"][0]).at[H:H2].set(p["b2b"][0])
    b3 = jnp.zeros((H2p,), jnp.float32)
    b3 = b3.at[0].set(p["b3a"][0, 0]).at[1].set(p["b3b"][0, 0])
    b_all = jnp.stack([b1, b2, b3], axis=0)                # (3, 2Hp) f32

    return dict(w1s=w1s, w1a=w1a, w2=w2, w3=w3, b=b_all)


def _reference_forward(state, action, p):
    """Pure-JAX fp32 reference matching PyTorch semantics."""
    x = jnp.concatenate([state, action], axis=1)

    def head(x, w1, b1, w2, b2, w3, b3):
        h = jnp.maximum(x @ w1 + b1, 0.0)
        h = jnp.maximum(h @ w2 + b2, 0.0)
        return h @ w3 + b3

    q1 = head(x, p["w1a"], p["b1a"], p["w2a"], p["b2a"], p["w3a"], p["b3a"])
    q2 = head(x, p["w1b"], p["b1b"], p["w2b"], p["b2b"], p["w3b"], p["b3b"])
    return q1, q2


if __name__ == "__main__":
    state_dim, action_dim, hidden_dim = 12, 4, 32

    key = jax.random.PRNGKey(0)
    k_state, k_action, k_params, k_state2, k_action2 = jax.random.split(key, 5)

    params = init_params(k_params, state_dim, action_dim, hidden_dim)
    packed = pack_params(params, state_dim, action_dim, hidden_dim)

    # --- Test 1: small batch, single tile, f32 inputs ------------------------
    B = 8
    state = jax.random.normal(k_state, (B, state_dim), jnp.float32)
    action = jax.random.normal(k_action, (B, action_dim), jnp.float32)

    q1, q2 = qnetwork_forward(state, action, packed)
    jax.block_until_ready((q1, q2))

    q1_ref, q2_ref = _reference_forward(state, action, params)
    assert q1.shape == (B, 1) and q2.shape == (B, 1)
    # bf16 matmul inputs with f32 accumulation -> loosened tolerance vs fp32.
    assert jnp.allclose(q1, q1_ref, atol=2e-2, rtol=2e-2)
    assert jnp.allclose(q2, q2_ref, atol=2e-2, rtol=2e-2)

    # --- Test 2: bf16 inputs end-to-end (halves the HBM read stream) ---------
    q1b, q2b = qnetwork_forward(state.astype(jnp.bfloat16),
                                action.astype(jnp.bfloat16), packed)
    jax.block_until_ready((q1b, q2b))
    assert jnp.allclose(q1b, q1_ref, atol=3e-2, rtol=3e-2)
    assert jnp.allclose(q2b, q2_ref, atol=3e-2, rtol=3e-2)

    # --- Test 3: ragged multi-tile path (grid > 1, partial last tile) --------
    B2 = 300
    state2 = jax.random.normal(k_state2, (B2, state_dim), jnp.float32)
    action2 = jax.random.normal(k_action2, (B2, action_dim), jnp.float32)
    q1m, q2m = qnetwork_forward(state2, action2, packed, max_tb=128)
    jax.block_until_ready((q1m, q2m))

    q1m_ref, q2m_ref = _reference_forward(state2, action2, params)
    assert q1m.shape == (B2, 1) and q2m.shape == (B2, 1)
    assert jnp.allclose(q1m, q1m_ref, atol=5e-2, rtol=5e-2)
    assert jnp.allclose(q2m, q2m_ref, atol=5e-2, rtol=5e-2)

    print("KERNEL_OK")
</pallas_src>

<mosaic_0001>
module attributes {stable_mosaic.version = 11 : i64} {
  func.func @_qnet_kernel(%arg0: i32, %arg1: memref<8x12xf32, #tpu.memory_space<vmem>>, %arg2: memref<8x4xf32, #tpu.memory_space<vmem>>, %arg3: memref<12x128xbf16, #tpu.memory_space<vmem>>, %arg4: memref<4x128xbf16, #tpu.memory_space<vmem>>, %arg5: memref<128x128xbf16, #tpu.memory_space<vmem>>, %arg6: memref<128x2xbf16, #tpu.memory_space<vmem>>, %arg7: memref<3x128xf32, #tpu.memory_space<vmem>>, %arg8: memref<8x2xf32, #tpu.memory_space<vmem>>) attributes {dimension_semantics = [#tpu.dimension_semantics<parallel>], iteration_bounds = array<i64: 1>, scalar_prefetch = 0 : i64, scratch_operands = 0 : i64, tpu.core_type = #tpu.core_type<tc>, window_params = [{transform_indices = @transform_0, window_bounds = array<i64: 8, 12>}, {transform_indices = @transform_1, window_bounds = array<i64: 8, 4>}, {pipeline_mode = #tpu.pipeline_mode<synchronous>, transform_indices = @transform_2, window_bounds = array<i64: 12, 128>}, {pipeline_mode = #tpu.pipeline_mode<synchronous>, transform_indices = @transform_3, window_bounds = array<i64: 4, 128>}, {pipeline_mode = #tpu.pipeline_mode<synchronous>, transform_indices = @transform_4, window_bounds = array<i64: 128, 128>}, {pipeline_mode = #tpu.pipeline_mode<synchronous>, transform_indices = @transform_5, window_bounds = array<i64: 128, 2>}, {pipeline_mode = #tpu.pipeline_mode<synchronous>, transform_indices = @transform_6, window_bounds = array<i64: 3, 128>}, {transform_indices = @transform_7, window_bounds = array<i64: 8, 2>}]} {
    %c0 = arith.constant 0 : index
    %c0_0 = arith.constant 0 : index
    %0 = vector.load %arg7[%c0, %c0_0] : memref<3x128xf32, #tpu.memory_space<vmem>>, vector<1x128xf32>
    %c1 = arith.constant 1 : index
    %c0_1 = arith.constant 0 : index
    %1 = vector.load %arg7[%c1, %c0_1] : memref<3x128xf32, #tpu.memory_space<vmem>>, vector<1x128xf32>
    %c2 = arith.constant 2 : index
    %c0_2 = arith.constant 0 : index
    %2 = vector.load %arg7[%c2, %c0_2] : memref<3x128xf32, #tpu.memory_space<vmem>>, vector<1x128xf32>
    %3 = vector.extract_strided_slice %2 {offsets = [0, 0], sizes = [1, 2], strides = [1, 1]} : vector<1x128xf32> to vector<1x2xf32>
    %c0_3 = arith.constant 0 : index
    %c0_4 = arith.constant 0 : index
    %4 = vector.load %arg1[%c0_3, %c0_4] : memref<8x12xf32, #tpu.memory_space<vmem>>, vector<8x12xf32>
    %5 = arith.truncf %4 : vector<8x12xf32> to vector<8x12xbf16>
    %c0_5 = arith.constant 0 : index
    %c0_6 = arith.constant 0 : index
    %6 = vector.load %arg2[%c0_5, %c0_6] : memref<8x4xf32, #tpu.memory_space<vmem>>, vector<8x4xf32>
    %7 = arith.truncf %6 : vector<8x4xf32> to vector<8x4xbf16>
    %c0_7 = arith.constant 0 : index
    %c0_8 = arith.constant 0 : index
    %8 = vector.load %arg3[%c0_7, %c0_8] : memref<12x128xbf16, #tpu.memory_space<vmem>>, vector<12x128xbf16>
    %cst = arith.constant dense<0.000000e+00> : vector<8x128xf32>
    %9 = tpu.matmul %5, %8, %cst {dimension_numbers = #tpu.dot_dimension_numbers<[1], [0], [0], [1], [0, 0, 1, 1], [], []>} : vector<8x12xbf16>, vector<12x128xbf16>, vector<8x128xf32> -> vector<8x128xf32>
    %c0_9 = arith.constant 0 : index
    %c0_10 = arith.constant 0 : index
    %10 = vector.load %arg4[%c0_9, %c0_10] : memref<4x128xbf16, #tpu.memory_space<vmem>>, vector<4x128xbf16>
    %cst_11 = arith.constant dense<0.000000e+00> : vector<8x128xf32>
    %11 = tpu.matmul %7, %10, %cst_11 {dimension_numbers = #tpu.dot_dimension_numbers<[1], [0], [0], [1], [0, 0, 1, 1], [], []>} : vector<8x4xbf16>, vector<4x128xbf16>, vector<8x128xf32> -> vector<8x128xf32>
    %12 = arith.addf %9, %11 : vector<8x128xf32>
    %13 = vector.broadcast %0 : vector<1x128xf32> to vector<8x128xf32>
    %14 = arith.addf %12, %13 : vector<8x128xf32>
    %cst_12 = arith.constant 0.000000e+00 : f32
    %15 = vector.broadcast %cst_12 : f32 to vector<8x128xf32>
    %16 = arith.maximumf %14, %15 : vector<8x128xf32>
    %17 = arith.truncf %16 : vector<8x128xf32> to vector<8x128xbf16>
    %c0_13 = arith.constant 0 : index
    %c0_14 = arith.constant 0 : index
    %18 = vector.load %arg5[%c0_13, %c0_14] : memref<128x128xbf16, #tpu.memory_space<vmem>>, vector<128x128xbf16>
    %cst_15 = arith.constant dense<0.000000e+00> : vector<8x128xf32>
    %19 = tpu.matmul %17, %18, %cst_15 {dimension_numbers = #tpu.dot_dimension_numbers<[1], [0], [0], [1], [0, 0, 1, 1], [], []>} : vector<8x128xbf16>, vector<128x128xbf16>, vector<8x128xf32> -> vector<8x128xf32>
    %20 = vector.broadcast %1 : vector<1x128xf32> to vector<8x128xf32>
    %21 = arith.addf %19, %20 : vector<8x128xf32>
    %cst_16 = arith.constant 0.000000e+00 : f32
    %22 = vector.broadcast %cst_16 : f32 to vector<8x128xf32>
    %23 = arith.maximumf %21, %22 : vector<8x128xf32>
    %24 = arith.truncf %23 : vector<8x128xf32> to vector<8x128xbf16>
    %c0_17 = arith.constant 0 : index
    %c0_18 = arith.constant 0 : index
    %25 = vector.load %arg6[%c0_17, %c0_18] : memref<128x2xbf16, #tpu.memory_space<vmem>>, vector<128x2xbf16>
    %cst_19 = arith.constant dense<0.000000e+00> : vector<8x2xf32>
    %26 = tpu.matmul %24, %25, %cst_19 {dimension_numbers = #tpu.dot_dimension_numbers<[1], [0], [0], [1], [0, 0, 1, 1], [], []>} : vector<8x128xbf16>, vector<128x2xbf16>, vector<8x2xf32> -> vector<8x2xf32>
    %27 = vector.broadcast %3 : vector<1x2xf32> to vector<8x2xf32>
    %28 = arith.addf %26, %27 : vector<8x2xf32>
    %c0_20 = arith.constant 0 : index
    %c0_21 = arith.constant 0 : index
    %29 = vector.load %arg8[%c0_20, %c0_21] : memref<8x2xf32, #tpu.memory_space<vmem>>, vector<8x2xf32>
    tpu.vector_store %arg8[%c0_20, %c0_21], %28 {strides = array<i32>} : memref<8x2xf32, #tpu.memory_space<vmem>>, vector<8x2xf32>,
    return
  }
  func.func @transform_0(%arg0: i32) -> (i32, i32) {
    %c0_i32 = arith.constant 0 : i32
    %c0_i32_0 = arith.constant 0 : i32
    return %arg0, %c0_i32 : i32, i32
  }
  func.func @transform_1(%arg0: i32) -> (i32, i32) {
    %c0_i32 = arith.constant 0 : i32
    %c0_i32_0 = arith.constant 0 : i32
    return %arg0, %c0_i32 : i32, i32
  }
  func.func @transform_2(%arg0: i32) -> (i32, i32) {
    %c0_i32 = arith.constant 0 : i32
    %c0_i32_0 = arith.constant 0 : i32
    %c0_i32_1 = arith.constant 0 : i32
    return %c0_i32, %c0_i32_0 : i32, i32
  }
  func.func @transform_3(%arg0: i32) -> (i32, i32) {
    %c0_i32 = arith.constant 0 : i32
    %c0_i32_0 = arith.constant 0 : i32
    %c0_i32_1 = arith.constant 0 : i32
    return %c0_i32, %c0_i32_0 : i32, i32
  }
  func.func @transform_4(%arg0: i32) -> (i32, i32) {
    %c0_i32 = arith.constant 0 : i32
    %c0_i32_0 = arith.constant 0 : i32
    %c0_i32_1 = arith.constant 0 : i32
    return %c0_i32, %c0_i32_0 : i32, i32
  }
  func.func @transform_5(%arg0: i32) -> (i32, i32) {
    %c0_i32 = arith.constant 0 : i32
    %c0_i32_0 = arith.constant 0 : i32
    %c0_i32_1 = arith.constant 0 : i32
    return %c0_i32, %c0_i32_0 : i32, i32
  }
  func.func @transform_6(%arg0: i32) -> (i32, i32) {
    %c0_i32 = arith.constant 0 : i32
    %c0_i32_0 = arith.constant 0 : i32
    %c0_i32_1 = arith.constant 0 : i32
    return %c0_i32, %c0_i32_0 : i32, i32
  }
  func.func @transform_7(%arg0: i32) -> (i32, i32) {
    %c0_i32 = arith.constant 0 : i32
    %c0_i32_0 = arith.constant 0 : i32
    return %arg0, %c0_i32 : i32, i32
  }
}

</mosaic_0001>

<bundles_post_ra>
// kernel: tpu_custom_call.1
= control target key start
LH: loop header
LB: loop body
LE: loop exit
PB: predicated region body
PF: predicated region fallthrough
CT: control target
= control target key end

     0   :  { %vm41_vm0 = vcmask 1041408   ;;  %vm94_vm1 = vcmask 1045504   ;;  %v484_v0 = vmov 0.0   ;;  %vm485_vm2 = vmmov 0   ;;  %s625_s3 = inlined_call_operand.vmem [shape: bf16[4,128], index: 3, kind: input, shape index: {}]   ;;  %s626_s2 = inlined_call_operand.vmem [shape: bf16[12,128], index: 2, kind: input, shape index: {}]   ;;  %s627_s1 = inlined_call_operand.vmem [shape: f32[8,4], index: 1, kind: input, shape index: {}]   ;;  %s628_s0 = inlined_call_operand.vmem [shape: f32[8,12], index: 0, kind: input, shape index: {}]   ;;  %s629_s4 = inlined_call_operand.vmem [shape: bf16[128,128], index: 4, kind: input, shape index: {}]   ;;  %s630_s5 = inlined_call_operand.vmem [shape: bf16[128,2], index: 5, kind: input, shape index: {}]   ;;  %s631_s6 = inlined_call_operand.vmem [shape: f32[3,128], index: 6, kind: input, shape index: {}]   ;;  %s632_s7 = inlined_call_operand.vmem [shape: f32[8,2], index: 7, kind: output, shape index: {}]  }
   0x1   :  { %413 = vmatprep.subr.bf16.mxu0 %v484_v0  ;;  %v36_v1 = vld [vmem:[%s625_s3] sm:$0x3]  ;;  %419 = vmatprep.subr.bf16.mxu1 %v484_v0  ;;  %vm37_vm3 = vcmask 31744   ;;  %vm90_vm4 = vcmask 97280   ;;  %v469_v10 = vld [vmem:[%s629_s4 + $0x8] sm:$0xff]   ;;  %v470_v11 = vld [vmem:[%s629_s4 + $0x10] sm:$0xff]  }
   0x2   :  { %v43_v2 = vsel %vm41_vm0, %v36_v1, 0  ;;  %415 = vmatprep.mubr.msk.bf16.mxu0 %vm485_vm2, %v484_v0  ;;  %v467_v3 = vld [vmem:[%s626_s2] sm:$0x3f]   ;;  %421 = vmatprep.mubr.msk.bf16.mxu1 %vm485_vm2, %v484_v0  ;;  %v471_v12 = vld [vmem:[%s629_s4 + $0x18] sm:$0xff]   ;;  %v473_v14 = vld [vmem:[%s629_s4 + $0x28] sm:$0xff]   ;;  %vm363_vm5 = vcmask 15360  }
   0x3   :  { %v32_v4 = vld [vmem:[%s627_s1] sm:$0xff]  ;;  %414 = vmatpush3.bf16.msra.mxu0 %v43_v2  ;;  %v96_v8 = vsel %vm94_vm1, %v467_v3, 0  ;;  %v474_v15 = vld [vmem:[%s629_s4 + $0x30] sm:$0xff]   ;;  %v475_v16 = vld [vmem:[%s629_s4 + $0x38] sm:$0xff]  }
   0x4   :  { %v30_v5 = vld [vmem:[%s628_s0] sm:$0xff]  ;;  %v33_v6 = vpack.c.bf16 %v32_v4, %v32_v4  ;;  %425 = vmatprep.subr.bf16.mxu0 %v484_v0  ;;  %420 = vmatpush3.bf16.msra.mxu1 %v96_v8  ;;  %v477_v18 = vld [vmem:[%s630_s5 + $0x8] sm:$0xff]   ;;  %v478_v19 = vld [vmem:[%s630_s5 + $0x10] sm:$0xff]  }
   0x5   :  { %v468_v7 = vld [vmem:[%s629_s4] sm:$0xff]   ;;  %v31_v9 = vpack.c.bf16 %v30_v5, %v30_v5  ;;  %445 = vmatprep.subr.bf16.mxu1 %v484_v0  ;;  %v479_v20 = vld [vmem:[%s630_s5 + $0x18] sm:$0xff]   ;;  %v481_v22 = vld [vmem:[%s630_s5 + $0x28] sm:$0xff]  }
   0x6   :  { %416 = vmatmul.mubr.msk.bf16.vlgmr.msra.gmra.mrb[0].mxu0 %vm37_vm3, %v33_v6  ;;  %v472_v13 = vld [vmem:[%s629_s4 + $0x20] sm:$0xff]   ;;  %v482_v36 = vld [vmem:[%s630_s5 + $0x30] sm:$0xff]   ;;  %v483_v37 = vld [vmem:[%s630_s5 + $0x38] sm:$0xff]  }
   0x7   :  { %426 = vmatpush3.bf16.msra.mxu0 %v468_v7  ;;  %441 = vmatprep.mubr.msk.bf16.mxu0 %vm485_vm2, %v484_v0  ;;  %v476_v17 = vld [vmem:[%s630_s5] sm:$0xff]  }
   0x8   :  { %422 = vmatmul.mubr.msk.bf16.vlgmr.msra.gmra.mrb[0].mxu1 %vm90_vm4, %v31_v9  ;;  %427 = vmatprep.subr.bf16.mxu0 %v484_v0  ;;  %v480_v21 = vld [vmem:[%s630_s5 + $0x20] sm:$0xff]  }
   0x9   :  { %461 = vmatprep.mubr.msk.bf16.mxu1 %vm485_vm2, %v484_v0  ;;  %446 = vmatpush3.bf16.msra.mxu1 %v476_v17  ;;  %v372_v26 = vld [vmem:[%s631_s6] ss:$0 sm:$0xff]  ;;  %v373_v38 = vld [vmem:[%s631_s6 + $0x1] ss:$0 sm:$0xff]  ;;  %v382_v46 = vld [vmem:[%s631_s6 + $0x2] ss:$0 sm:$0xff] }
   0xa   :  { %447 = vmatprep.subr.bf16.mxu1 %v484_v0 }
   0xb   :  { %428 = vmatpush3.bf16.msra.mxu0 %v469_v10 }
   0xc   :  { %429 = vmatprep.subr.bf16.mxu0 %v484_v0 }
   0xd   :  { %448 = vmatpush3.bf16.msra.mxu1 %v477_v18 }
   0xe   :  { %449 = vmatprep.subr.bf16.mxu1 %v484_v0 }
   0xf   :  { %430 = vmatpush3.bf16.msra.mxu0 %v470_v11 }
  0x10   :  { %431 = vmatprep.subr.bf16.mxu0 %v484_v0 }
  0x11   :  { %450 = vmatpush3.bf16.msra.mxu1 %v478_v19 }
  0x12   :  { %451 = vmatprep.subr.bf16.mxu1 %v484_v0 }
  0x13   :  { %432 = vmatpush3.bf16.msra.mxu0 %v471_v12 }
  0x14   :  { %433 = vmatprep.subr.bf16.mxu0 %v484_v0 }
  0x15   :  { %452 = vmatpush3.bf16.msra.mxu1 %v479_v20 }
  0x16   :  { %453 = vmatprep.subr.bf16.mxu1 %v484_v0 }
  0x17   :  { %434 = vmatpush3.bf16.msra.mxu0 %v472_v13 }
  0x18   :  { %435 = vmatprep.subr.bf16.mxu0 %v484_v0 }
  0x19   :  { %454 = vmatpush3.bf16.msra.mxu1 %v480_v21 }
  0x1a   :  { %455 = vmatprep.subr.bf16.mxu1 %v484_v0 }
  0x1b   :  { %436 = vmatpush3.bf16.msra.mxu0 %v473_v14 }
  0x1c   :  { %437 = vmatprep.subr.bf16.mxu0 %v484_v0 }
  0x1d   :  { %456 = vmatpush3.bf16.msra.mxu1 %v481_v22 }
  0x1e   :  { %457 = vmatprep.subr.bf16.mxu1 %v484_v0 }
  0x1f   :  { %438 = vmatpush3.bf16.msra.mxu0 %v474_v15 }
  0x20   :  { %439 = vmatprep.subr.bf16.mxu0 %v484_v0 }
  0x21   :  { %458 = vmatpush3.bf16.msra.mxu1 %v482_v36 }
  0x22   :  { %459 = vmatprep.subr.bf16.mxu1 %v484_v0 }
  0x23   :  { %440 = vmatpush3.bf16.msra.mxu0 %v475_v16 }
  0x25   :  { %460 = vmatpush3.bf16.msra.mxu1 %v483_v37 }
  0xd9   :  { %v79_v23 = vpop.f32.mrb[0].mxu0 }
  0xda   :  { %v417_v24 = vpop.f32.mrb[1].mxu0 }
  0xdb   :  { %v82_v25 = vpop.f32.mrb[2].mxu0  ;;  %v132_v27 = vpop.f32.mrb[0].mxu1 }
  0xdc   :  { %v133_v28 = vadd.f32 %v132_v27, %v79_v23  ;;  %v418_v29 = vpop.f32.mrb[3].mxu0  ;;  %v423_v30 = vpop.f32.mrb[1].mxu1 }
  0xdd   :  { %v135_v31 = vpop.f32.mrb[2].mxu1 }
  0xde   :  { %v142_v32 = vadd.f32 %v372_v26, %v133_v28  ;;  %v424_v33 = vpop.f32.mrb[3].mxu1 }
  0xe0   :  { %v143_v34 = vmax.f32 %v142_v32, 0.0 }
  0xe2   :  { %v144_v35 = vpack.c.bf16 %v143_v34, %v143_v34 }
  0xe4   :  { %442 = vmatmul.mubr.bf16.vlgmr.msra.gmra.mrb[4].mxu0 %v144_v35 }
 0x1b7   :  { %v247_v39 = vpop.f32.mrb[4].mxu0 }
 0x1b8   :  { %v248_v40 = vadd.f32 %v373_v38, %v247_v39  ;;  %v443_v41 = vpop.f32.mrb[5].mxu0 }
 0x1b9   :  { %v250_v42 = vpop.f32.mrb[6].mxu0 }
 0x1ba   :  { %v253_v43 = vmax.f32 %v248_v40, 0.0  ;;  %v444_v44 = vpop.f32.mrb[7].mxu0 }
 0x1bc   :  { %v254_v45 = vpack.c.bf16 %v253_v43, %v253_v43 }
 0x1be   :  { %462 = vmatmul.mubr.bf16.vlgmr.msra.gmra.mrb[4].mxu1 %v254_v45 }
 0x291   :  { %v357_v47 = vpop.f32.mrb[4].mxu1 }
 0x292   :  { %v358_v48 = vadd.f32 %v382_v46, %v357_v47  ;;  %v463_v49 = vpop.f32.mrb[5].mxu1 }
 0x293   :  { %v360_v50 = vpop.f32.mrb[6].mxu1 }
 0x294   :  { %364 = vst.msk [vmem:[%s632_s7] sm:$0xff] %vm363_vm5, %v358_v48  ;;  %v464_v51 = vpop.f32.mrb[7].mxu1 }

</bundles_post_ra>
